<compile_context>
chip_gen: v5e
topology: v5e:2x2
jax: 0.10.0
libtpu: 0.0.40
codegen_flags: <defaults>
</compile_context>

<pallas_src>
import jax
import jax.numpy as jnp
from jax.experimental import pallas as pl
from jax.experimental.pallas import tpu as pltpu

D_IN, H12, H3, N_OUT = 196, 30, 15, 5


def _round_up(x, m):
    return (x + m - 1) // m * m


def _evennet_kernel(x_ref,
                    w12_ref, b12_ref,
                    w3_ref, b3_ref,
                    w4_ref, b4_ref,
                    o_ref):
    """Fused 3-matmul MLP on one batch tile. All weights live fully in VMEM."""
    x = x_ref[...]                                                     # (bm, 196)

    # Folded Linear(196,60) + Linear(60,30), then ReLU.
    h = jnp.dot(x, w12_ref[...], preferred_element_type=jnp.float32) + b12_ref[...]
    h = jnp.maximum(h, 0.0)

    # Linear(30, 15) + ReLU.
    h = jnp.dot(h, w3_ref[...], preferred_element_type=jnp.float32) + b3_ref[...]
    h = jnp.maximum(h, 0.0)

    # Logits Linear(15, 5).
    y = jnp.dot(h, w4_ref[...], preferred_element_type=jnp.float32) + b4_ref[...]
    o_ref[...] = y.astype(o_ref.dtype)                                 # (bm, 5)


def _prepare_params(params):
    """Fold layer1 into layer2 (exact: no nonlinearity between them)."""
    w1, b1 = params["w1"], params["b1"]   # (196, 60), (1, 60)
    w2, b2 = params["w2"], params["b2"]   # (60, 30),  (1, 30)
    w3, b3 = params["w3"], params["b3"]   # (30, 15),  (1, 15)
    w4, b4 = params["w4"], params["b4"]   # (15, 5),   (1, 5)

    w12 = w1 @ w2                          # (196, 30)
    b12 = b1 @ w2 + b2                     # (1, 30)
    return w12, b12, w3, b3, w4, b4


def evennet_forward(x, params, *, bm=2048):
    """x: (N, 196) float32. params: dict of transposed (in, out) weights + (1, out) biases."""
    N, d_in = x.shape
    assert d_in == D_IN

    w12, b12, w3, b3, w4, b4 = _prepare_params(params)

    # Batch tile: multiple of 8 sublanes, large for step-overhead amortization, but
    # capped so there are at least 2 grid steps (both v7x TensorCores get work).
    bm_eff = max(8, min(bm, _round_up(pl.cdiv(N, 2), 8)))
    grid = (pl.cdiv(N, bm_eff),)          # ragged last block handled by Pallas masking

    def full(arr):
        return pl.BlockSpec(arr.shape, lambda i: (0, 0))

    flops = 2 * N * (D_IN * H12 + H12 * H3 + H3 * N_OUT)
    weight_elems = D_IN * H12 + H12 + H12 * H3 + H3 + H3 * N_OUT + N_OUT
    bytes_accessed = 4 * (N * (D_IN + N_OUT) + weight_elems)

    out = pl.pallas_call(
        _evennet_kernel,
        out_shape=jax.ShapeDtypeStruct((N, N_OUT), jnp.float32),
        grid_spec=pltpu.PrefetchScalarGridSpec(
            num_scalar_prefetch=0,
            grid=grid,
            in_specs=[
                pl.BlockSpec((bm_eff, D_IN), lambda i: (i, 0)),   # x batch tile, K=196
                full(w12), full(b12),
                full(w3), full(b3),
                full(w4), full(b4),
            ],
            out_specs=pl.BlockSpec((bm_eff, N_OUT), lambda i: (i, 0)),
        ),
        compiler_params=pltpu.CompilerParams(
            dimension_semantics=("parallel",)),
        cost_estimate=pl.CostEstimate(
            flops=flops, transcendentals=0, bytes_accessed=bytes_accessed),
    )(x.astype(jnp.float32), w12, b12, w3, b3, w4, b4)

    return out


def init_params(key):
    """Deterministic init mimicking PyTorch nn.Linear default:
    U(-1/sqrt(fan_in), 1/sqrt(fan_in)). Weights stored transposed: (in, out)."""
    dims = [(196, 60), (60, 30), (30, 15), (15, 5)]
    params = {}
    keys = jax.random.split(key, 2 * len(dims))
    for idx, (fan_in, fan_out) in enumerate(dims):
        bound = 1.0 / jnp.sqrt(float(fan_in))
        wk, bk = keys[2 * idx], keys[2 * idx + 1]
        params[f"w{idx + 1}"] = jax.random.uniform(
            wk, (fan_in, fan_out), jnp.float32, minval=-bound, maxval=bound)
        params[f"b{idx + 1}"] = jax.random.uniform(
            bk, (1, fan_out), jnp.float32, minval=-bound, maxval=bound)
    return params


def reference_forward(x, params):
    """Unfused 4-layer reference, mirrors the PyTorch module exactly."""
    h = x @ params["w1"] + params["b1"]
    h = jnp.maximum(h @ params["w2"] + params["b2"], 0.0)
    h = jnp.maximum(h @ params["w3"] + params["b3"], 0.0)
    return h @ params["w4"] + params["b4"]


# TODO(synk): training loop (SGD, CrossEntropyLoss, Mnist CSV dataset) is host-side and
# not part of the forward pass; only the forward is implemented as a Pallas kernel.

if __name__ == "__main__":
    key = jax.random.PRNGKey(0)
    pkey, xkey = jax.random.split(key)

    params = init_params(pkey)
    # Small batch of flattened 14x14 "even MNIST" images: (300, 196).
    # N is deliberately NOT a multiple of the tile so the ragged-last-block path
    # (Pallas-masked input read / output write) and the 2-step grid are exercised.
    N = 300
    x = jax.random.normal(xkey, (N, 196), jnp.float32)

    fwd = jax.jit(evennet_forward)
    y = fwd(x, params)
    jax.block_until_ready(y)

    y_ref = reference_forward(x, params)
    assert y.shape == (N, 5)
    # Layer-1/2 folding is mathematically exact; tolerance covers f32 reassociation.
    assert jnp.allclose(y, y_ref, atol=1e-3, rtol=1e-3), "mismatch vs reference"

    print("KERNEL_OK")
</pallas_src>

<mosaic_0001>
module attributes {stable_mosaic.version = 11 : i64} {
  func.func @_evennet_kernel(%arg0: i32, %arg1: memref<152x196xf32, #tpu.memory_space<vmem>>, %arg2: memref<196x30xf32, #tpu.memory_space<vmem>>, %arg3: memref<1x30xf32, #tpu.memory_space<vmem>>, %arg4: memref<30x15xf32, #tpu.memory_space<vmem>>, %arg5: memref<1x15xf32, #tpu.memory_space<vmem>>, %arg6: memref<15x5xf32, #tpu.memory_space<vmem>>, %arg7: memref<1x5xf32, #tpu.memory_space<vmem>>, %arg8: memref<152x5xf32, #tpu.memory_space<vmem>>) attributes {dimension_semantics = [#tpu.dimension_semantics<parallel>], iteration_bounds = array<i64: 2>, scalar_prefetch = 0 : i64, scratch_operands = 0 : i64, tpu.core_type = #tpu.core_type<tc>, window_params = [{transform_indices = @transform_0, window_bounds = array<i64: 152, 196>}, {pipeline_mode = #tpu.pipeline_mode<synchronous>, transform_indices = @transform_1, window_bounds = array<i64: 196, 30>}, {pipeline_mode = #tpu.pipeline_mode<synchronous>, transform_indices = @transform_2, window_bounds = array<i64: 1, 30>}, {pipeline_mode = #tpu.pipeline_mode<synchronous>, transform_indices = @transform_3, window_bounds = array<i64: 30, 15>}, {pipeline_mode = #tpu.pipeline_mode<synchronous>, transform_indices = @transform_4, window_bounds = array<i64: 1, 15>}, {pipeline_mode = #tpu.pipeline_mode<synchronous>, transform_indices = @transform_5, window_bounds = array<i64: 15, 5>}, {pipeline_mode = #tpu.pipeline_mode<synchronous>, transform_indices = @transform_6, window_bounds = array<i64: 1, 5>}, {transform_indices = @transform_7, window_bounds = array<i64: 152, 5>}]} {
    %c0 = arith.constant 0 : index
    %c0_0 = arith.constant 0 : index
    %0 = vector.load %arg1[%c0, %c0_0] : memref<152x196xf32, #tpu.memory_space<vmem>>, vector<152x196xf32>
    %c0_1 = arith.constant 0 : index
    %c0_2 = arith.constant 0 : index
    %1 = vector.load %arg2[%c0_1, %c0_2] : memref<196x30xf32, #tpu.memory_space<vmem>>, vector<196x30xf32>
    %cst = arith.constant dense<0.000000e+00> : vector<152x30xf32>
    %2 = tpu.matmul %0, %1, %cst {dimension_numbers = #tpu.dot_dimension_numbers<[1], [0], [0], [1], [0, 0, 1, 1], [], []>} : vector<152x196xf32>, vector<196x30xf32>, vector<152x30xf32> -> vector<152x30xf32>
    %c0_3 = arith.constant 0 : index
    %c0_4 = arith.constant 0 : index
    %3 = vector.load %arg3[%c0_3, %c0_4] : memref<1x30xf32, #tpu.memory_space<vmem>>, vector<1x30xf32>
    %4 = vector.broadcast %3 : vector<1x30xf32> to vector<152x30xf32>
    %5 = arith.addf %2, %4 : vector<152x30xf32>
    %cst_5 = arith.constant 0.000000e+00 : f32
    %6 = vector.broadcast %cst_5 : f32 to vector<152x30xf32>
    %7 = arith.maximumf %5, %6 : vector<152x30xf32>
    %c0_6 = arith.constant 0 : index
    %c0_7 = arith.constant 0 : index
    %8 = vector.load %arg4[%c0_6, %c0_7] : memref<30x15xf32, #tpu.memory_space<vmem>>, vector<30x15xf32>
    %cst_8 = arith.constant dense<0.000000e+00> : vector<152x15xf32>
    %9 = tpu.matmul %7, %8, %cst_8 {dimension_numbers = #tpu.dot_dimension_numbers<[1], [0], [0], [1], [0, 0, 1, 1], [], []>} : vector<152x30xf32>, vector<30x15xf32>, vector<152x15xf32> -> vector<152x15xf32>
    %c0_9 = arith.constant 0 : index
    %c0_10 = arith.constant 0 : index
    %10 = vector.load %arg5[%c0_9, %c0_10] : memref<1x15xf32, #tpu.memory_space<vmem>>, vector<1x15xf32>
    %11 = vector.broadcast %10 : vector<1x15xf32> to vector<152x15xf32>
    %12 = arith.addf %9, %11 : vector<152x15xf32>
    %cst_11 = arith.constant 0.000000e+00 : f32
    %13 = vector.broadcast %cst_11 : f32 to vector<152x15xf32>
    %14 = arith.maximumf %12, %13 : vector<152x15xf32>
    %c0_12 = arith.constant 0 : index
    %c0_13 = arith.constant 0 : index
    %15 = vector.load %arg6[%c0_12, %c0_13] : memref<15x5xf32, #tpu.memory_space<vmem>>, vector<15x5xf32>
    %cst_14 = arith.constant dense<0.000000e+00> : vector<152x5xf32>
    %16 = tpu.matmul %14, %15, %cst_14 {dimension_numbers = #tpu.dot_dimension_numbers<[1], [0], [0], [1], [0, 0, 1, 1], [], []>} : vector<152x15xf32>, vector<15x5xf32>, vector<152x5xf32> -> vector<152x5xf32>
    %c0_15 = arith.constant 0 : index
    %c0_16 = arith.constant 0 : index
    %17 = vector.load %arg7[%c0_15, %c0_16] : memref<1x5xf32, #tpu.memory_space<vmem>>, vector<1x5xf32>
    %18 = vector.broadcast %17 : vector<1x5xf32> to vector<152x5xf32>
    %19 = arith.addf %16, %18 : vector<152x5xf32>
    %c0_17 = arith.constant 0 : index
    %c0_18 = arith.constant 0 : index
    %20 = vector.load %arg8[%c0_17, %c0_18] : memref<152x5xf32, #tpu.memory_space<vmem>>, vector<152x5xf32>
    tpu.vector_store %arg8[%c0_17, %c0_18], %19 {strides = array<i32>} : memref<152x5xf32, #tpu.memory_space<vmem>>, vector<152x5xf32>,
    return
  }
  func.func @transform_0(%arg0: i32) -> (i32, i32) {
    %c0_i32 = arith.constant 0 : i32
    %c0_i32_0 = arith.constant 0 : i32
    return %arg0, %c0_i32 : i32, i32
  }
  func.func @transform_1(%arg0: i32) -> (i32, i32) {
    %c0_i32 = arith.constant 0 : i32
    %c0_i32_0 = arith.constant 0 : i32
    %c0_i32_1 = arith.constant 0 : i32
    return %c0_i32, %c0_i32_0 : i32, i32
  }
  func.func @transform_2(%arg0: i32) -> (i32, i32) {
    %c0_i32 = arith.constant 0 : i32
    %c0_i32_0 = arith.constant 0 : i32
    %c0_i32_1 = arith.constant 0 : i32
    return %c0_i32, %c0_i32_0 : i32, i32
  }
  func.func @transform_3(%arg0: i32) -> (i32, i32) {
    %c0_i32 = arith.constant 0 : i32
    %c0_i32_0 = arith.constant 0 : i32
    %c0_i32_1 = arith.constant 0 : i32
    return %c0_i32, %c0_i32_0 : i32, i32
  }
  func.func @transform_4(%arg0: i32) -> (i32, i32) {
    %c0_i32 = arith.constant 0 : i32
    %c0_i32_0 = arith.constant 0 : i32
    %c0_i32_1 = arith.constant 0 : i32
    return %c0_i32, %c0_i32_0 : i32, i32
  }
  func.func @transform_5(%arg0: i32) -> (i32, i32) {
    %c0_i32 = arith.constant 0 : i32
    %c0_i32_0 = arith.constant 0 : i32
    %c0_i32_1 = arith.constant 0 : i32
    return %c0_i32, %c0_i32_0 : i32, i32
  }
  func.func @transform_6(%arg0: i32) -> (i32, i32) {
    %c0_i32 = arith.constant 0 : i32
    %c0_i32_0 = arith.constant 0 : i32
    %c0_i32_1 = arith.constant 0 : i32
    return %c0_i32, %c0_i32_0 : i32, i32
  }
  func.func @transform_7(%arg0: i32) -> (i32, i32) {
    %c0_i32 = arith.constant 0 : i32
    %c0_i32_0 = arith.constant 0 : i32
    return %arg0, %c0_i32 : i32, i32
  }
}

</mosaic_0001>

<bundles_post_ra>
// kernel: evennet_forward.1
= control target key start
LH: loop header
LB: loop body
LE: loop exit
PB: predicated region body
PF: predicated region fallthrough
CT: control target
= control target key end

     0   :  { %s1092_s24 = smov 0   ;;  %s1415_s0 = inlined_call_operand.vmem [shape: f32[300,196], index: 0, kind: input, shape index: {}]   ;;  %s1416_s1 = inlined_call_operand.vmem [shape: f32[196,30], index: 1, kind: input, shape index: {}]   ;;  %s1417_s2 = inlined_call_operand.vmem [shape: f32[1,30], index: 2, kind: input, shape index: {}]   ;;  %s1418_s3 = inlined_call_operand.vmem [shape: f32[30,15], index: 3, kind: input, shape index: {}]   ;;  %s1419_s4 = inlined_call_operand.vmem [shape: f32[1,15], index: 4, kind: input, shape index: {}]   ;;  %s1420_s5 = inlined_call_operand.vmem [shape: f32[15,5], index: 5, kind: input, shape index: {}]   ;;  %s1421_s6 = inlined_call_operand.vmem [shape: f32[1,5], index: 6, kind: input, shape index: {}]   ;;  %s1422_s7 = inlined_call_operand.vmem [shape: f32[300,5], index: 7, kind: output, shape index: {}]  }
   0x1 LB: > { %s962_s25 = sadd.s32 4294967295, %s1050_s24   ;;  %p966_p0 = scmp.ge.s32.totalorder %s1050_s24, 1  ;;  %s1050_s24 = sphi %s1092_s24, %s17_s24  }
   0x2   : > { %p239_p1 = scmp.lt.s32.totalorder %s1050_s24, 3 }
   0x4   : > { %p240_p2 = pnand %p966_p0, %p239_p1 }
   0x5   : > { %s272_s30 = smul.u32 (!%p240_p2), 19, %s962_s25 }
   0x6   : > { %243 = sbr.rel (%p240_p2) target bundleno = 590 (0x24e), region = 48 }
   0x7   : > { %p273_p3 = scmp.lt.s32.totalorder (!%p240_p2), %s272_s30, 37 }
   0xb   : > { %v338_v0 = vld [vmem:[%s1416_s1 + $0x78] sm:$0xff]  ;;  %v337_v1 = vld [vmem:[%s1416_s1 + $0x70] sm:$0xff]  ;;  %vm410_vm0 = vcmask 1043456   ;;  %v336_v2 = vld [vmem:[%s1416_s1 + $0x68] sm:$0xff]  ;;  %s1424_s30 = smov (!%p273_p3, %s272_s30), 37  ;;  %vm352_vm1 = vcmask 556032  }
   0xc   : > { %414 = vmatpush.msra.mxu0 %v338_v0  ;;  %v347_v3 = vld [vmem:[%s1416_s1 + $0xc0] sm:$0xf]  ;;  %v346_v4 = vld [vmem:[%s1416_s1 + $0xb8] sm:$0xff]  ;;  %v345_v6 = vld [vmem:[%s1416_s1 + $0xb0] sm:$0xff]  ;;  %s1032_s15 = sshll.u32 %s1424_s30, 4  ;;  %vm647_vm2 = vcmask 1045504  }
   0xd   : > { %v335_v5 = vld [vmem:[%s1416_s1 + $0x60] sm:$0xff]  ;;  %970 = vmatpush.msk.msra.mxu1 %vm410_vm0, %v347_v3  ;;  %v334_v7 = vld [vmem:[%s1416_s1 + $0x58] sm:$0xff]  ;;  %v344_v8 = vld [vmem:[%s1416_s1 + $0xa8] sm:$0xff]  ;;  %s1160_s22 = scalar_lea.vmem %s1415_s0, %s1032_s15  ;;  %vm589_vm3 = vcmask 244736   ;;  %vm808_vm4 = vcmask 1046528   ;;  %vm750_vm5 = vcmask 121856  }
   0xe   : > { %415 = vmatpush.msra.mxu0 %v337_v1  ;;  %v333_v9 = vld [vmem:[%s1416_s1 + $0x50] sm:$0xff]  ;;  %v332_v10 = vld [vmem:[%s1416_s1 + $0x48] sm:$0xff]  ;;  %v343_v11 = vld [vmem:[%s1416_s1 + $0xa0] sm:$0xff]  ;;  %s969_s11 = sshll.u32 %s1424_s30, 3  ;;  %vm886_vm6 = vcmask 39936  }
   0xf   : > { %496 = vmatpush.msra.mxu1 %v346_v4  ;;  %v342_v12 = vld [vmem:[%s1416_s1 + $0x98] sm:$0xff]  ;;  %v331_v13 = vld [vmem:[%s1416_s1 + $0x40] sm:$0xff]  ;;  %v341_v14 = vld [vmem:[%s1416_s1 + $0x90] sm:$0xff]  ;;  %s1349_s16 = scalar_lea.vmem %s1422_s7, %s969_s11 }
  0x10   : > { %416 = vmatpush.msra.mxu0 %v336_v2  ;;  %v330_v15 = vld [vmem:[%s1416_s1 + $0x38] sm:$0xff]  ;;  %v340_v16 = vld [vmem:[%s1416_s1 + $0x88] sm:$0xff]  ;;  %v329_v17 = vld [vmem:[%s1416_s1 + $0x30] sm:$0xff] }
  0x11   : > { %497 = vmatpush.msra.mxu1 %v345_v6  ;;  %v339_v18 = vld [vmem:[%s1416_s1 + $0x80] sm:$0xff]  ;;  %v328_v19 = vld [vmem:[%s1416_s1 + $0x28] sm:$0xff]  ;;  %v326_v22 = vld [vmem:[%s1416_s1 + $0x18] sm:$0xff] }
  0x12   : > { %417 = vmatpush.msra.mxu0 %v335_v5  ;;  %v286_v20 = vld [vmem:[%s1160_s22 + $0x8] sm:$0xff]  ;;  %v327_v21 = vld [vmem:[%s1416_s1 + $0x20] sm:$0xff]  ;;  %v325_v23 = vld [vmem:[%s1416_s1 + $0x10] sm:$0xff] }
  0x13   : > { %498 = vmatpush.msra.mxu1 %v344_v8  ;;  %v324_v24 = vld [vmem:[%s1416_s1 + $0x8] sm:$0xff]  ;;  %v288_v25 = vld [vmem:[%s1160_s22 + $0x18] sm:$0xff]  ;;  %v323_v26 = vld [vmem:[%s1416_s1] sm:$0xff] }
  0x14   : > { %418 = vmatpush.msra.mxu0 %v334_v7  ;;  %v285_v27 = vld [vmem:[%s1160_s22] sm:$0xff]  ;;  %v290_v28 = vld [vmem:[%s1160_s22 + $0x28] sm:$0xff]  ;;  %v287_v29 = vld [vmem:[%s1160_s22 + $0x10] sm:$0xff] }
  0x15   : > { %499 = vmatpush.msra.mxu1 %v343_v11  ;;  %v292_v30 = vld [vmem:[%s1160_s22 + $0x38] sm:$0xff]  ;;  %v289_v31 = vld [vmem:[%s1160_s22 + $0x20] sm:$0xff]  ;;  %v294_v32 = vld [vmem:[%s1160_s22 + $0x48] sm:$0xff] }
  0x16   : > { %419 = vmatpush.msra.mxu0 %v333_v9  ;;  %v291_v33 = vld [vmem:[%s1160_s22 + $0x30] sm:$0xff]  ;;  %v296_v34 = vld [vmem:[%s1160_s22 + $0x58] sm:$0xff]  ;;  %v293_v35 = vld [vmem:[%s1160_s22 + $0x40] sm:$0xff] }
  0x17   : > { %500 = vmatpush.msra.mxu1 %v342_v12  ;;  %v298_v36 = vld [vmem:[%s1160_s22 + $0x68] sm:$0xff]  ;;  %v295_v37 = vld [vmem:[%s1160_s22 + $0x50] sm:$0xff]  ;;  %v300_v38 = vld [vmem:[%s1160_s22 + $0x78] sm:$0xff] }
  0x18   : > { %420 = vmatpush.msra.mxu0 %v332_v10  ;;  %v297_v39 = vld [vmem:[%s1160_s22 + $0x60] sm:$0xff]  ;;  %v302_v40 = vld [vmem:[%s1160_s22 + $0x88] sm:$0xff]  ;;  %v299_v41 = vld [vmem:[%s1160_s22 + $0x70] sm:$0xff] }
  0x19   : > { %501 = vmatpush.msra.mxu1 %v341_v14  ;;  %v304_v42 = vld [vmem:[%s1160_s22 + $0x98] sm:$0xff]  ;;  %v301_v43 = vld [vmem:[%s1160_s22 + $0x80] sm:$0xff]  ;;  %v306_v44 = vld [vmem:[%s1160_s22 + $0xa8] sm:$0xff] }
  0x1a   : > { %421 = vmatpush.msra.mxu0 %v331_v13  ;;  %v303_v45 = vld [vmem:[%s1160_s22 + $0x90] sm:$0xff]  ;;  %v308_v46 = vld [vmem:[%s1160_s22 + $0xb8] sm:$0xff]  ;;  %v305_v47 = vld [vmem:[%s1160_s22 + $0xa0] sm:$0xff] }
  0x1b   : > { %502 = vmatpush.msra.mxu1 %v340_v16  ;;  %v310_v48 = vld [vmem:[%s1160_s22 + $0xc8] sm:$0xff]  ;;  %v307_v49 = vld [vmem:[%s1160_s22 + $0xb0] sm:$0xff]  ;;  %v312_v50 = vld [vmem:[%s1160_s22 + $0xd8] sm:$0xff] }
  0x1c   : > { %422 = vmatpush.msra.mxu0 %v330_v15  ;;  %v584_v51 = vld [vmem:[%s1418_s3 + $0x18] sm:$0x3f]  ;;  %v309_v52 = vld [vmem:[%s1160_s22 + $0xc0] sm:$0xff]  ;;  %v583_v53 = vld [vmem:[%s1418_s3 + $0x10] sm:$0xff] }
  0x1d   : > { %503 = vmatpush.msra.mxu1 %v339_v18  ;;  %990 = vmatpush.msk.msra.mxu2 %vm647_vm2, %v584_v51  ;;  %v582_v54 = vld [vmem:[%s1418_s3 + $0x8] sm:$0xff]  ;;  %v581_v56 = vld [vmem:[%s1418_s3] sm:$0xff]  ;;  %v311_v57 = vld [vmem:[%s1160_s22 + $0xd0] sm:$0xff] }
  0x1e   : > { %423 = vmatpush.msra.mxu0 %v329_v17  ;;  %971 = vmatmul.msk.f32.vlgmr.msra.gmra.mxu1 %vm352_vm1, %v286_v20  ;;  %v314_v55 = vld [vmem:[%s1160_s22 + $0xe8] sm:$0xff]  ;;  %v316_v58 = vld [vmem:[%s1160_s22 + $0xf8] sm:$0xff]  ;;  %v313_v59 = vld [vmem:[%s1160_s22 + $0xe0] sm:$0xff] }
  0x1f   : > { %664 = vmatpush.msra.mxu2 %v583_v53  ;;  %v318_v61 = vld [vmem:[%s1160_s22 + $0x108] sm:$0xff]  ;;  %v315_v62 = vld [vmem:[%s1160_s22 + $0xf0] sm:$0xff]  ;;  %v1248_v63 = vld [vmem:[%s1417_s2] ss:$0 sm:$0xff] }
  0x20   : > { %424 = vmatpush.msra.mxu0 %v328_v19  ;;  %v320_v1 = vld [vmem:[%s1160_s22 + $0x118] sm:$0xff]  ;;  %v317_v3 = vld [vmem:[%s1160_s22 + $0x100] sm:$0xff]  ;;  %v322_v8 = vld [vmem:[%s1160_s22 + $0x128] sm:$0xff] }
  0x21   : > { %665 = vmatpush.msra.mxu2 %v582_v54  ;;  %v319_v10 = vld [vmem:[%s1160_s22 + $0x110] sm:$0xff]  ;;  %v321_v16 = vld [vmem:[%s1160_s22 + $0x120] sm:$0xff] }
  0x22   : > { %425 = vmatpush.msra.mxu0 %v327_v21 }
  0x23   : > { %666 = vmatpush.msra.mxu2 %v581_v56 }
  0x24   : > { %426 = vmatpush.msra.mxu0 %v326_v22 }
  0x26   : > { %427 = vmatpush.msra.mxu0 %v325_v23  ;;  %972 = vmatmul.msk.f32.gmra.mxu1 %vm352_vm1, %v288_v25 }
  0x28   : > { %428 = vmatpush.msra.mxu0 %v324_v24 }
  0x2a   : > { %429 = vmatpush.msra.mxu0 %v323_v26 }
  0x2b   : > { %430 = vmatmul.f32.vlgmr.msra.gmra.mxu0 %v285_v27 }
  0x2e   : > { %973 = vmatmul.msk.f32.gmra.mxu1 %vm352_vm1, %v290_v28 }
  0x33   : > { %433 = vmatmul.f32.gmra.mxu0 %v287_v29 }
  0x36   : > { %974 = vmatmul.msk.f32.gmra.mxu1 %vm352_vm1, %v292_v30 }
  0x3b   : > { %436 = vmatmul.f32.gmra.mxu0 %v289_v31 }
  0x3e   : > { %975 = vmatmul.msk.f32.gmra.mxu1 %vm352_vm1, %v294_v32 }
  0x43   : > { %439 = vmatmul.f32.gmra.mxu0 %v291_v33 }
  0x46   : > { %976 = vmatmul.msk.f32.gmra.mxu1 %vm352_vm1, %v296_v34 }
  0x4b   : > { %442 = vmatmul.f32.gmra.mxu0 %v293_v35 }
  0x4e   : > { %977 = vmatmul.msk.f32.gmra.mxu1 %vm352_vm1, %v298_v36 }
  0x53   : > { %445 = vmatmul.f32.gmra.mxu0 %v295_v37 }
  0x56   : > { %978 = vmatmul.msk.f32.gmra.mxu1 %vm352_vm1, %v300_v38 }
  0x5b   : > { %448 = vmatmul.f32.gmra.mxu0 %v297_v39 }
  0x5e   : > { %979 = vmatmul.msk.f32.gmra.mxu1 %vm352_vm1, %v302_v40 }
  0x63   : > { %451 = vmatmul.f32.gmra.mxu0 %v299_v41 }
  0x66   : > { %980 = vmatmul.msk.f32.gmra.mxu1 %vm352_vm1, %v304_v42 }
  0x6b   : > { %454 = vmatmul.f32.gmra.mxu0 %v301_v43 }
  0x6e   : > { %981 = vmatmul.msk.f32.gmra.mxu1 %vm352_vm1, %v306_v44 }
  0x73   : > { %457 = vmatmul.f32.gmra.mxu0 %v303_v45 }
  0x76   : > { %982 = vmatmul.msk.f32.gmra.mxu1 %vm352_vm1, %v308_v46 }
  0x7b   : > { %460 = vmatmul.f32.gmra.mxu0 %v305_v47 }
  0x7e   : > { %983 = vmatmul.msk.f32.gmra.mxu1 %vm352_vm1, %v310_v48 }
  0x83   : > { %463 = vmatmul.f32.gmra.mxu0 %v307_v49 }
  0x86   : > { %984 = vmatmul.msk.f32.gmra.mxu1 %vm352_vm1, %v312_v50 }
  0x8b   : > { %466 = vmatmul.f32.gmra.mxu0 %v309_v52 }
  0x8e   : > { %985 = vmatmul.msk.f32.gmra.mxu1 %vm352_vm1, %v314_v55 }
  0x93   : > { %469 = vmatmul.f32.gmra.mxu0 %v311_v57 }
  0x96   : > { %986 = vmatmul.msk.f32.gmra.mxu1 %vm352_vm1, %v316_v58 }
  0x9b   : > { %472 = vmatmul.f32.gmra.mxu0 %v313_v59  ;;  %v505_v60 = vpop.f32.mrf.mxu1 }
  0x9e   : > { %987 = vmatmul.msk.f32.gmra.mxu1 %vm352_vm1, %v318_v61 }
  0xa3   : > { %475 = vmatmul.f32.gmra.mxu0 %v315_v62  ;;  %v508_v0 = vpop.f32.mrf.mxu1 }
  0xa6   : > { %988 = vmatmul.msk.f32.gmra.mxu1 %vm352_vm1, %v320_v1 }
  0xa8   : > { %v431_v2 = vpop.f32.mrf.mxu0 }
  0xa9   : > { %v432_v4 = vadd.f32 %v1248_v63, %v431_v2 }
  0xab   : > { %v506_v5 = vadd.f32 %v505_v60, %v432_v4  ;;  %478 = vmatmul.f32.gmra.mxu0 %v317_v3  ;;  %v511_v7 = vpop.f32.mrf.mxu1 }
  0xad   : > { %v562_v6 = vmax.f32 %v506_v5, 0.0 }
  0xae   : > { %989 = vmatmul.msk.f32.gmra.mxu1 %vm352_vm1, %v322_v8 }
  0xaf   : > { %991 = vmatmul.msk.f32.vlgmr.msra.gmra.mxu2 %vm589_vm3, %v562_v6 }
  0xb0   : > { %v434_v9 = vpop.f32.mrf.mxu0 }
  0xb1   : > { %v435_v11 = vadd.f32 %v1248_v63, %v434_v9 }
  0xb3   : > { %v509_v12 = vadd.f32 %v508_v0, %v435_v11  ;;  %481 = vmatmul.f32.gmra.mxu0 %v319_v10  ;;  %v514_v14 = vpop.f32.mrf.mxu1  ;;  %v745_v11 = vld [vmem:[%s1420_s5 + $0x8] sm:$0x7f] }
  0xb4   : > { %1010 = vmatpush.msk.msra.mxu3 %vm808_vm4, %v745_v11 }
  0xb5   : > { %v563_v13 = vmax.f32 %v509_v12, 0.0 }
  0xb7   : > { %992 = vmatmul.msk.f32.gmra.mxu2 %vm589_vm3, %v563_v13  ;;  %v744_v13 = vld [vmem:[%s1420_s5] sm:$0xff] }
  0xb8   : > { %v437_v15 = vpop.f32.mrf.mxu0  ;;  %827 = vmatpush.msra.mxu3 %v744_v13 }
  0xb9   : > { %v438_v17 = vadd.f32 %v1248_v63, %v437_v15 }
  0xbb   : > { %v512_v18 = vadd.f32 %v511_v7, %v438_v17  ;;  %484 = vmatmul.f32.gmra.mxu0 %v321_v16  ;;  %v517_v20 = vpop.f32.mrf.mxu1 }
  0xbd   : > { %v564_v19 = vmax.f32 %v512_v18, 0.0 }
  0xbf   : > { %993 = vmatmul.msk.f32.gmra.mxu2 %vm589_vm3, %v564_v19 }
  0xc0   : > { %v440_v21 = vpop.f32.mrf.mxu0 }
  0xc1   : > { %v441_v22 = vadd.f32 %v1248_v63, %v440_v21 }
  0xc3   : > { %v515_v23 = vadd.f32 %v514_v14, %v441_v22  ;;  %v520_v25 = vpop.f32.mrf.mxu1 }
  0xc5   : > { %v565_v24 = vmax.f32 %v515_v23, 0.0 }
  0xc7   : > { %994 = vmatmul.msk.f32.gmra.mxu2 %vm589_vm3, %v565_v24 }
  0xc8   : > { %v443_v26 = vpop.f32.mrf.mxu0 }
  0xc9   : > { %v444_v27 = vadd.f32 %v1248_v63, %v443_v26 }
  0xcb   : > { %v518_v28 = vadd.f32 %v517_v20, %v444_v27  ;;  %v523_v30 = vpop.f32.mrf.mxu1 }
  0xcd   : > { %v566_v29 = vmax.f32 %v518_v28, 0.0 }
  0xcf   : > { %995 = vmatmul.msk.f32.gmra.mxu2 %vm589_vm3, %v566_v29  ;;  %v1300_v29 = vld [vmem:[%s1419_s4] ss:$0 sm:$0xff] }
  0xd0   : > { %v446_v31 = vpop.f32.mrf.mxu0 }
  0xd1   : > { %v447_v32 = vadd.f32 %v1248_v63, %v446_v31 }
  0xd3   : > { %v521_v33 = vadd.f32 %v520_v25, %v447_v32  ;;  %v526_v35 = vpop.f32.mrf.mxu1 }
  0xd5   : > { %v567_v34 = vmax.f32 %v521_v33, 0.0 }
  0xd7   : > { %996 = vmatmul.msk.f32.gmra.mxu2 %vm589_vm3, %v567_v34 }
  0xd8   : > { %v449_v36 = vpop.f32.mrf.mxu0 }
  0xd9   : > { %v450_v37 = vadd.f32 %v1248_v63, %v449_v36 }
  0xdb   : > { %v524_v38 = vadd.f32 %v523_v30, %v450_v37  ;;  %v529_v40 = vpop.f32.mrf.mxu1 }
  0xdd   : > { %v568_v39 = vmax.f32 %v524_v38, 0.0 }
  0xdf   : > { %997 = vmatmul.msk.f32.gmra.mxu2 %vm589_vm3, %v568_v39 }
  0xe0   : > { %v452_v41 = vpop.f32.mrf.mxu0 }
  0xe1   : > { %v453_v42 = vadd.f32 %v1248_v63, %v452_v41 }
  0xe3   : > { %v527_v43 = vadd.f32 %v526_v35, %v453_v42  ;;  %v532_v45 = vpop.f32.mrf.mxu1 }
  0xe5   : > { %v569_v44 = vmax.f32 %v527_v43, 0.0 }
  0xe7   : > { %998 = vmatmul.msk.f32.gmra.mxu2 %vm589_vm3, %v569_v44 }
  0xe8   : > { %v455_v46 = vpop.f32.mrf.mxu0 }
  0xe9   : > { %v456_v47 = vadd.f32 %v1248_v63, %v455_v46 }
  0xeb   : > { %v530_v48 = vadd.f32 %v529_v40, %v456_v47  ;;  %v535_v50 = vpop.f32.mrf.mxu1 }
  0xed   : > { %v570_v49 = vmax.f32 %v530_v48, 0.0 }
  0xef   : > { %999 = vmatmul.msk.f32.gmra.mxu2 %vm589_vm3, %v570_v49 }
  0xf0   : > { %v458_v51 = vpop.f32.mrf.mxu0 }
  0xf1   : > { %v459_v52 = vadd.f32 %v1248_v63, %v458_v51 }
  0xf3   : > { %v533_v53 = vadd.f32 %v532_v45, %v459_v52  ;;  %v538_v55 = vpop.f32.mrf.mxu1 }
  0xf5   : > { %v571_v54 = vmax.f32 %v533_v53, 0.0 }
  0xf7   : > { %1000 = vmatmul.msk.f32.gmra.mxu2 %vm589_vm3, %v571_v54 }
  0xf8   : > { %v461_v56 = vpop.f32.mrf.mxu0 }
  0xf9   : > { %v462_v57 = vadd.f32 %v1248_v63, %v461_v56 }
  0xfb   : > { %v536_v58 = vadd.f32 %v535_v50, %v462_v57  ;;  %v541_v60 = vpop.f32.mrf.mxu1 }
  0xfd   : > { %v572_v59 = vmax.f32 %v536_v58, 0.0 }
  0xff   : > { %1001 = vmatmul.msk.f32.gmra.mxu2 %vm589_vm3, %v572_v59 }
 0x100   : > { %v464_v61 = vpop.f32.mrf.mxu0 }
 0x101   : > { %v465_v62 = vadd.f32 %v1248_v63, %v464_v61 }
 0x103   : > { %v539_v0 = vadd.f32 %v538_v55, %v465_v62  ;;  %v544_v2 = vpop.f32.mrf.mxu1 }
 0x105   : > { %v573_v1 = vmax.f32 %v539_v0, 0.0 }
 0x107   : > { %1002 = vmatmul.msk.f32.gmra.mxu2 %vm589_vm3, %v573_v1 }
 0x108   : > { %v467_v3 = vpop.f32.mrf.mxu0 }
 0x109   : > { %v468_v4 = vadd.f32 %v1248_v63, %v467_v3 }
 0x10b   : > { %v542_v5 = vadd.f32 %v541_v60, %v468_v4  ;;  %v547_v8 = vpop.f32.mrf.mxu1 }
 0x10d   : > { %v574_v6 = vmax.f32 %v542_v5, 0.0 }
 0x10f   : > { %1003 = vmatmul.msk.f32.gmra.mxu2 %vm589_vm3, %v574_v6 }
 0x110   : > { %v470_v7 = vpop.f32.mrf.mxu0 }
 0x111   : > { %v471_v9 = vadd.f32 %v1248_v63, %v470_v7 }
 0x113   : > { %v545_v10 = vadd.f32 %v544_v2, %v471_v9  ;;  %v550_v16 = vpop.f32.mrf.mxu1 }
 0x115   : > { %v575_v12 = vmax.f32 %v545_v10, 0.0 }
 0x117   : > { %1004 = vmatmul.msk.f32.gmra.mxu2 %vm589_vm3, %v575_v12 }
 0x118   : > { %v473_v14 = vpop.f32.mrf.mxu0 }
 0x119   : > { %v474_v15 = vadd.f32 %v1248_v63, %v473_v14 }
 0x11b   : > { %v548_v17 = vadd.f32 %v547_v8, %v474_v15  ;;  %v553_v22 = vpop.f32.mrf.mxu1 }
 0x11d   : > { %v576_v18 = vmax.f32 %v548_v17, 0.0 }
 0x11f   : > { %1005 = vmatmul.msk.f32.gmra.mxu2 %vm589_vm3, %v576_v18 }
 0x120   : > { %v476_v19 = vpop.f32.mrf.mxu0 }
 0x121   : > { %v477_v20 = vadd.f32 %v1248_v63, %v476_v19 }
 0x123   : > { %v551_v21 = vadd.f32 %v550_v16, %v477_v20  ;;  %v556_v28 = vpop.f32.mrf.mxu1 }
 0x125   : > { %v577_v23 = vmax.f32 %v551_v21, 0.0 }
 0x127   : > { %1006 = vmatmul.msk.f32.gmra.mxu2 %vm589_vm3, %v577_v23 }
 0x128   : > { %v479_v24 = vpop.f32.mrf.mxu0 }
 0x129   : > { %v480_v25 = vadd.f32 %v1248_v63, %v479_v24 }
 0x12b   : > { %v554_v26 = vadd.f32 %v553_v22, %v480_v25  ;;  %v559_v38 = vpop.f32.mrf.mxu1 }
 0x12d   : > { %v578_v27 = vmax.f32 %v554_v26, 0.0  ;;  %v1344_v26 = vld [vmem:[%s1421_s6] ss:$0 sm:$0xff] }
 0x12f   : > { %1007 = vmatmul.msk.f32.gmra.mxu2 %vm589_vm3, %v578_v27 }
 0x130   : > { %v482_v30 = vpop.f32.mrf.mxu0 }
 0x131   : > { %v483_v31 = vadd.f32 %v1248_v63, %v482_v30 }
 0x132   : > { %v668_v32 = vpop.f32.mrf.mxu2 }
 0x133   : > { %v557_v33 = vadd.f32 %v556_v28, %v483_v31  ;;  %v669_v34 = vadd.f32 %v1300_v29, %v668_v32 }
 0x135   : > { %v579_v35 = vmax.f32 %v557_v33, 0.0  ;;  %v725_v36 = vmax.f32 %v669_v34, 0.0 }
 0x137   : > { %1008 = vmatmul.msk.f32.gmra.mxu2 %vm589_vm3, %v579_v35  ;;  %1011 = vmatmul.msk.f32.vlgmr.msra.gmra.mxu3 %vm750_vm5, %v725_v36 }
 0x138   : > { %v485_v37 = vpop.f32.mrf.mxu0 }
 0x139   : > { %v486_v39 = vadd.f32 %v1248_v63, %v485_v37 }
 0x13a   : > { %v671_v40 = vpop.f32.mrf.mxu2 }
 0x13b   : > { %v560_v41 = vadd.f32 %v559_v38, %v486_v39  ;;  %v672_v42 = vadd.f32 %v1300_v29, %v671_v40 }
 0x13d   : > { %v580_v43 = vmax.f32 %v560_v41, 0.0  ;;  %v726_v44 = vmax.f32 %v672_v42, 0.0 }
 0x13f   : > { %1009 = vmatmul.msk.f32.gmra.mxu2 %vm589_vm3, %v580_v43  ;;  %1012 = vmatmul.msk.f32.gmra.mxu3 %vm750_vm5, %v726_v44 }
 0x142   : > { %v674_v45 = vpop.f32.mrf.mxu2 }
 0x143   : > { %v675_v46 = vadd.f32 %v1300_v29, %v674_v45 }
 0x145   : > { %v727_v47 = vmax.f32 %v675_v46, 0.0 }
 0x147   : > { %1013 = vmatmul.msk.f32.gmra.mxu3 %vm750_vm5, %v727_v47 }
 0x14a   : > { %v677_v48 = vpop.f32.mrf.mxu2 }
 0x14b   : > { %v678_v49 = vadd.f32 %v1300_v29, %v677_v48 }
 0x14d   : > { %v728_v63 = vmax.f32 %v678_v49, 0.0 }
 0x14f   : > { %1014 = vmatmul.msk.f32.gmra.mxu3 %vm750_vm5, %v728_v63 }
 0x152   : > { %v680_v50 = vpop.f32.mrf.mxu2 }
 0x153   : > { %v681_v51 = vadd.f32 %v1300_v29, %v680_v50 }
 0x155   : > { %v729_v52 = vmax.f32 %v681_v51, 0.0 }
 0x157   : > { %1015 = vmatmul.msk.f32.gmra.mxu3 %vm750_vm5, %v729_v52 }
 0x15a   : > { %v683_v53 = vpop.f32.mrf.mxu2 }
 0x15b   : > { %v684_v54 = vadd.f32 %v1300_v29, %v683_v53 }
 0x15d   : > { %v730_v55 = vmax.f32 %v684_v54, 0.0 }
 0x15f   : > { %1016 = vmatmul.msk.f32.gmra.mxu3 %vm750_vm5, %v730_v55 }
 0x162   : > { %v686_v56 = vpop.f32.mrf.mxu2 }
 0x163   : > { %v687_v57 = vadd.f32 %v1300_v29, %v686_v56 }
 0x165   : > { %v731_v58 = vmax.f32 %v687_v57, 0.0 }
 0x167   : > { %1017 = vmatmul.msk.f32.gmra.mxu3 %vm750_vm5, %v731_v58 }
 0x16a   : > { %v689_v59 = vpop.f32.mrf.mxu2 }
 0x16b   : > { %v690_v60 = vadd.f32 %v1300_v29, %v689_v59 }
 0x16d   : > { %v732_v61 = vmax.f32 %v690_v60, 0.0 }
 0x16f   : > { %1018 = vmatmul.msk.f32.gmra.mxu3 %vm750_vm5, %v732_v61 }
 0x172   : > { %v692_v62 = vpop.f32.mrf.mxu2 }
 0x173   : > { %v693_v0 = vadd.f32 %v1300_v29, %v692_v62 }
 0x175   : > { %v733_v1 = vmax.f32 %v693_v0, 0.0 }
 0x177   : > { %1019 = vmatmul.msk.f32.gmra.mxu3 %vm750_vm5, %v733_v1 }
 0x17a   : > { %v695_v2 = vpop.f32.mrf.mxu2 }
 0x17b   : > { %v696_v3 = vadd.f32 %v1300_v29, %v695_v2 }
 0x17d   : > { %v734_v4 = vmax.f32 %v696_v3, 0.0 }
 0x17f   : > { %1020 = vmatmul.msk.f32.gmra.mxu3 %vm750_vm5, %v734_v4 }
 0x182   : > { %v698_v5 = vpop.f32.mrf.mxu2 }
 0x183   : > { %v699_v6 = vadd.f32 %v1300_v29, %v698_v5 }
 0x185   : > { %v735_v7 = vmax.f32 %v699_v6, 0.0 }
 0x187   : > { %1021 = vmatmul.msk.f32.gmra.mxu3 %vm750_vm5, %v735_v7 }
 0x18a   : > { %v701_v8 = vpop.f32.mrf.mxu2 }
 0x18b   : > { %v702_v9 = vadd.f32 %v1300_v29, %v701_v8 }
 0x18d   : > { %v736_v10 = vmax.f32 %v702_v9, 0.0 }
 0x18f   : > { %1022 = vmatmul.msk.f32.gmra.mxu3 %vm750_vm5, %v736_v10 }
 0x192   : > { %v704_v11 = vpop.f32.mrf.mxu2 }
 0x193   : > { %v705_v12 = vadd.f32 %v1300_v29, %v704_v11 }
 0x195   : > { %v737_v13 = vmax.f32 %v705_v12, 0.0 }
 0x197   : > { %1023 = vmatmul.msk.f32.gmra.mxu3 %vm750_vm5, %v737_v13 }
 0x19a   : > { %v707_v14 = vpop.f32.mrf.mxu2 }
 0x19b   : > { %v708_v15 = vadd.f32 %v1300_v29, %v707_v14 }
 0x19d   : > { %v738_v16 = vmax.f32 %v708_v15, 0.0 }
 0x19f   : > { %1024 = vmatmul.msk.f32.gmra.mxu3 %vm750_vm5, %v738_v16 }
 0x1a2   : > { %v710_v17 = vpop.f32.mrf.mxu2 }
 0x1a3   : > { %v711_v18 = vadd.f32 %v1300_v29, %v710_v17 }
 0x1a5   : > { %v739_v19 = vmax.f32 %v711_v18, 0.0 }
 0x1a7   : > { %1025 = vmatmul.msk.f32.gmra.mxu3 %vm750_vm5, %v739_v19 }
 0x1aa   : > { %v713_v20 = vpop.f32.mrf.mxu2 }
 0x1ab   : > { %v714_v21 = vadd.f32 %v1300_v29, %v713_v20 }
 0x1ad   : > { %v740_v22 = vmax.f32 %v714_v21, 0.0 }
 0x1af   : > { %1026 = vmatmul.msk.f32.gmra.mxu3 %vm750_vm5, %v740_v22 }
 0x1b2   : > { %v716_v23 = vpop.f32.mrf.mxu2 }
 0x1b3   : > { %v717_v24 = vadd.f32 %v1300_v29, %v716_v23 }
 0x1b5   : > { %v741_v25 = vmax.f32 %v717_v24, 0.0 }
 0x1b7   : > { %1027 = vmatmul.msk.f32.gmra.mxu3 %vm750_vm5, %v741_v25 }
 0x1ba   : > { %v719_v27 = vpop.f32.mrf.mxu2  ;;  %v829_v28 = vpop.f32.mrf.mxu3 }
 0x1bb   : > { %v720_v30 = vadd.f32 %v1300_v29, %v719_v27  ;;  %v830_v31 = vadd.f32 %v1344_v26, %v829_v28 }
 0x1bd   : > { %v742_v32 = vmax.f32 %v720_v30, 0.0  ;;  %887 = vst.msk [vmem:[%s1349_s16] sm:$0xff] %vm886_vm6, %v830_v31 }
 0x1bf   : > { %1028 = vmatmul.msk.f32.gmra.mxu3 %vm750_vm5, %v742_v32 }
 0x1c2   : > { %v722_v33 = vpop.f32.mrf.mxu2  ;;  %v832_v34 = vpop.f32.mrf.mxu3 }
 0x1c3   : > { %v723_v35 = vadd.f32 %v1300_v29, %v722_v33  ;;  %v833_v36 = vadd.f32 %v1344_v26, %v832_v34 }
 0x1c5   : > { %v743_v37 = vmax.f32 %v723_v35, 0.0  ;;  %888 = vst.msk [vmem:[%s1349_s16 + $0x8] sm:$0xff] %vm886_vm6, %v833_v36 }
 0x1c7   : > { %1029 = vmatmul.msk.f32.gmra.mxu3 %vm750_vm5, %v743_v37 }
 0x1ca   : > { %v835_v38 = vpop.f32.mrf.mxu3 }
 0x1cb   : > { %v836_v39 = vadd.f32 %v1344_v26, %v835_v38 }
 0x1cd   : > { %889 = vst.msk [vmem:[%s1349_s16 + $0x10] sm:$0xff] %vm886_vm6, %v836_v39 }
 0x1d2   : > { %v838_v40 = vpop.f32.mrf.mxu3 }
 0x1d3   : > { %v839_v41 = vadd.f32 %v1344_v26, %v838_v40 }
 0x1d5   : > { %890 = vst.msk [vmem:[%s1349_s16 + $0x18] sm:$0xff] %vm886_vm6, %v839_v41 }
 0x1da   : > { %v841_v29 = vpop.f32.mrf.mxu3 }
 0x1db   : > { %v842_v42 = vadd.f32 %v1344_v26, %v841_v29 }
 0x1dd   : > { %891 = vst.msk [vmem:[%s1349_s16 + $0x20] sm:$0xff] %vm886_vm6, %v842_v42 }
 0x1e2   : > { %v844_v43 = vpop.f32.mrf.mxu3 }
 0x1e3   : > { %v845_v44 = vadd.f32 %v1344_v26, %v844_v43 }
 0x1e5   : > { %892 = vst.msk [vmem:[%s1349_s16 + $0x28] sm:$0xff] %vm886_vm6, %v845_v44 }
 0x1ea   : > { %v847_v45 = vpop.f32.mrf.mxu3 }
 0x1eb   : > { %v848_v46 = vadd.f32 %v1344_v26, %v847_v45 }
 0x1ed   : > { %893 = vst.msk [vmem:[%s1349_s16 + $0x30] sm:$0xff] %vm886_vm6, %v848_v46 }
 0x1f2   : > { %v850_v47 = vpop.f32.mrf.mxu3 }
 0x1f3   : > { %v851_v48 = vadd.f32 %v1344_v26, %v850_v47 }
 0x1f5   : > { %894 = vst.msk [vmem:[%s1349_s16 + $0x38] sm:$0xff] %vm886_vm6, %v851_v48 }
 0x1fa   : > { %v853_v49 = vpop.f32.mrf.mxu3 }
 0x1fb   : > { %v854_v63 = vadd.f32 %v1344_v26, %v853_v49 }
 0x1fd   : > { %895 = vst.msk [vmem:[%s1349_s16 + $0x40] sm:$0xff] %vm886_vm6, %v854_v63 }
 0x202   : > { %v856_v50 = vpop.f32.mrf.mxu3 }
 0x203   : > { %v857_v51 = vadd.f32 %v1344_v26, %v856_v50 }
 0x205   : > { %896 = vst.msk [vmem:[%s1349_s16 + $0x48] sm:$0xff] %vm886_vm6, %v857_v51 }
 0x20a   : > { %v859_v52 = vpop.f32.mrf.mxu3 }
 0x20b   : > { %v860_v53 = vadd.f32 %v1344_v26, %v859_v52 }
 0x20d   : > { %897 = vst.msk [vmem:[%s1349_s16 + $0x50] sm:$0xff] %vm886_vm6, %v860_v53 }
 0x212   : > { %v862_v54 = vpop.f32.mrf.mxu3 }
 0x213   : > { %v863_v55 = vadd.f32 %v1344_v26, %v862_v54 }
 0x215   : > { %898 = vst.msk [vmem:[%s1349_s16 + $0x58] sm:$0xff] %vm886_vm6, %v863_v55 }
 0x21a   : > { %v865_v56 = vpop.f32.mrf.mxu3 }
 0x21b   : > { %v866_v57 = vadd.f32 %v1344_v26, %v865_v56 }
 0x21d   : > { %899 = vst.msk [vmem:[%s1349_s16 + $0x60] sm:$0xff] %vm886_vm6, %v866_v57 }
 0x222   : > { %v868_v58 = vpop.f32.mrf.mxu3 }
 0x223   : > { %v869_v59 = vadd.f32 %v1344_v26, %v868_v58 }
 0x225   : > { %900 = vst.msk [vmem:[%s1349_s16 + $0x68] sm:$0xff] %vm886_vm6, %v869_v59 }
 0x22a   : > { %v871_v60 = vpop.f32.mrf.mxu3 }
 0x22b   : > { %v872_v61 = vadd.f32 %v1344_v26, %v871_v60 }
 0x22d   : > { %901 = vst.msk [vmem:[%s1349_s16 + $0x70] sm:$0xff] %vm886_vm6, %v872_v61 }
 0x232   : > { %v874_v62 = vpop.f32.mrf.mxu3 }
 0x233   : > { %v875_v0 = vadd.f32 %v1344_v26, %v874_v62 }
 0x235   : > { %902 = vst.msk [vmem:[%s1349_s16 + $0x78] sm:$0xff] %vm886_vm6, %v875_v0 }
 0x23a   : > { %v877_v1 = vpop.f32.mrf.mxu3 }
 0x23b   : > { %v878_v2 = vadd.f32 %v1344_v26, %v877_v1 }
 0x23d   : > { %903 = vst.msk [vmem:[%s1349_s16 + $0x80] sm:$0xff] %vm886_vm6, %v878_v2 }
 0x242   : > { %v880_v3 = vpop.f32.mrf.mxu3 }
 0x243   : > { %v881_v4 = vadd.f32 %v1344_v26, %v880_v3 }
 0x245   : > { %904 = vst.msk [vmem:[%s1349_s16 + $0x88] sm:$0xff] %vm886_vm6, %v881_v4 }
 0x24a   : > { %v883_v5 = vpop.f32.mrf.mxu3 }
 0x24b   : > { %v884_v6 = vadd.f32 %v1344_v26, %v883_v5 }
 0x24d   : > { %905 = vst.msk [vmem:[%s1349_s16 + $0x90] sm:$0xff] %vm886_vm6, %v884_v6 }
 0x24e PF: > { %s17_s24 = sadd.s32 1, %s1050_s24  }
 0x24f   : > { %p14_p4 = scmp.ge.s32.totalorder %s17_s24, 4  }
 0x251   :  { %16 = sbr.rel (!%p14_p4) target bundleno = 1 (0x1), region = 78 }

</bundles_post_ra>
